<compile_context>
chip_gen: v6e
topology: v6e:2x2x1
jax: 0.10.0
libtpu: 0.0.40
codegen_flags: <defaults>
</compile_context>

<pallas_src>
import functools
import math

import jax
import jax.numpy as jnp
from jax.experimental import pallas as pl
from jax.experimental.pallas import tpu as pltpu


def _round_up(x, n):
    return -(-x // n) * n


def _safe_vmem_bytes():
    """Per-TensorCore VMEM capacity to budget against.

    128 MiB on v5e/v6e (1 TC/chip), 64 MiB per TC on v7x. If the query reports
    per-chip capacity on v7x we would overshoot, so never assume more than
    64 MiB -- for this HBM-bound kernel the extra VMEM on v5e/v6e buys nothing
    measurable (tiles are already multi-thousand rows).
    """
    try:
        cap = pltpu.get_tpu_info().vmem_capacity_bytes
    except Exception:
        cap = 64 * 1024 * 1024
    return min(cap, 64 * 1024 * 1024)


def _choose_tm(m, cin, cout, dtype_bytes, blk_budget_bytes):
    """Largest sublane-aligned row tile whose double-buffered x/out blocks fit
    the VMEM budget, clamped to the (row-aligned) problem size. No artificial
    row cap: for narrow channels 4K-8K-row tiles keep the ~0.35us/step
    pipeline overhead well under 5% of the per-step DMA time."""
    row_align = 16 if dtype_bytes < 4 else 8          # bf16 packs 16 rows per vreg
    if m < row_align:
        return max(m, 1)                              # full-dim block (== array dim)
    per_row = 2 * (cin + cout) * dtype_bytes          # double-buffered x + out rows
    tm = max(row_align, blk_budget_bytes // per_row)
    if tm >= 128:
        tm = (tm // 128) * 128                        # 128-row aligned DMA bursts
    else:
        tm = (tm // row_align) * row_align
    tm = min(tm, (m // row_align) * row_align)        # never exceed the problem
    return max(tm, row_align)


def _pseudo_identity_kernel(x_ref, w_ref, b_ref, out_ref, *, cpart):
    # x_ref:(tm, Cin)  w_ref:(Cin, Cpart)  b_ref:(1, Cpart)  out_ref:(tm, Cpart+Cin)
    part = jnp.dot(x_ref[...], w_ref[...], preferred_element_type=jnp.float32)
    part = part + b_ref[...].astype(jnp.float32)      # broadcast (1, Cpart) over rows
    # Two direct sliced stores into the output tile; no lane-axis concat.
    out_ref[:, :cpart] = part.astype(out_ref.dtype)
    # Re-read x_ref for the identity half instead of reusing the matmul operand
    # value: keeps the vreg live range short across the MXU op (no spills) and
    # lets the copy-half loads/stores interleave under the DMA shadow.
    out_ref[:, cpart:] = x_ref[...].astype(out_ref.dtype)


def pseudo_identity(x, w, b, *, tm=None):
    """x: (..., Cin); w: (Cin, Cpart); b: (Cpart,). Returns (..., Cpart + Cin)."""
    orig_shape = x.shape
    cin = orig_shape[-1]
    cpart = w.shape[1]
    cout = cpart + cin
    ds = jnp.dtype(x.dtype).itemsize
    dw = jnp.dtype(w.dtype).itemsize

    x2d = x.reshape(-1, cin)                          # leading-dim collapse: no copy
    m = x2d.shape[0]

    safe_vmem = _safe_vmem_bytes()
    # Whole (double-buffered) weight + bias stay VMEM-resident across the row grid.
    wgt_bytes = 2 * (cin * cpart + cpart) * dw
    # NOTE(perf): for weights of several MiB (tight on v7x's 64 MiB/TC), add a
    # second grid axis over Cpart instead of keeping the full weight resident.

    row_align = 16 if ds < 4 else 8
    auto_tm = tm is None
    if auto_tm:
        budget = max(int(safe_vmem * 0.45) - wgt_bytes,
                     2 * (cin + cout) * ds * row_align)
        tm = _choose_tm(m, cin, cout, ds, budget)

    steps = pl.cdiv(m, tm)
    if auto_tm and steps >= 2 and steps % 2 == 1 and m > row_align:
        # Best-effort even step count: v7x runs 2 TensorCores over the
        # "parallel" row axis, and an odd count idles one core for the tail
        # step. On single-TC v5e/v6e the extra step costs only ~0.35us.
        tm_even = _round_up(pl.cdiv(m, steps + 1), row_align)
        if row_align <= tm_even <= tm:
            tm = tm_even
            steps = pl.cdiv(m, tm)

    b2d = b.reshape(1, cpart)

    resident_bytes = 2 * tm * (cin + cout) * ds + wgt_bytes
    vmem_limit = int(min(safe_vmem, max(resident_bytes + (4 << 20), 32 << 20)))

    cost = pl.CostEstimate(
        flops=2 * m * cin * cpart,
        transcendentals=0,
        bytes_accessed=(m * cin + m * cout) * ds + (cin * cpart + cpart) * dw,
    )

    kernel = functools.partial(_pseudo_identity_kernel, cpart=cpart)

    out = pl.pallas_call(
        kernel,
        out_shape=jax.ShapeDtypeStruct((m, cout), x.dtype),
        grid_spec=pltpu.PrefetchScalarGridSpec(
            num_scalar_prefetch=0,
            grid=(steps,),                            # cdiv grid: ragged last block OK
            in_specs=[
                pl.BlockSpec((tm, cin), lambda i: (i, 0)),
                # Constant block index -> Pallas does not re-DMA w/b per step.
                pl.BlockSpec((cin, cpart), lambda i: (0, 0)),
                pl.BlockSpec((1, cpart), lambda i: (0, 0)),
            ],
            out_specs=pl.BlockSpec((tm, cout), lambda i: (i, 0)),
        ),
        compiler_params=pltpu.CompilerParams(
            dimension_semantics=("parallel",),
            vmem_limit_bytes=vmem_limit,
        ),
        cost_estimate=cost,
    )(x2d, w, b2d)

    return out.reshape(*orig_shape[:-1], cout)


def init_params(key, in_channels, out_channels, bias=True, dtype=jnp.float32):
    """Deterministic init mimicking torch.nn.Linear defaults (uniform +-1/sqrt(fan_in))."""
    assert out_channels > in_channels
    cpart = out_channels - in_channels
    kw, kb = jax.random.split(key)
    bound = 1.0 / math.sqrt(in_channels)
    # torch stores weight as (cpart, in); we keep it transposed as (in, cpart)
    w = jax.random.uniform(kw, (in_channels, cpart), dtype, minval=-bound, maxval=bound)
    if bias:
        b = jax.random.uniform(kb, (cpart,), dtype, minval=-bound, maxval=bound)
    else:
        b = jnp.zeros((cpart,), dtype)                # bias=False: adding zeros is exact
    return w, b


if __name__ == "__main__":
    key = jax.random.PRNGKey(0)
    k_x, k_p, k_x2, k_p2 = jax.random.split(key, 4)

    # Lane-dense case: Cin = Cpart = 128 -> both sliced stores are unmasked vst.
    batch, seq = 2, 8
    in_channels, out_channels = 128, 256
    x = jax.random.normal(k_x, (batch, seq, in_channels), dtype=jnp.float32)
    w, b = init_params(k_p, in_channels, out_channels, bias=True)

    y = jax.block_until_ready(pseudo_identity(x, w, b))
    ref = jnp.concatenate([x @ w + b, x], axis=-1)
    assert y.shape == (batch, seq, out_channels), y.shape
    assert jnp.allclose(y, ref, atol=1e-4, rtol=1e-4), float(jnp.max(jnp.abs(y - ref)))

    # Ragged case: M = 15 is not a tile multiple (exercises the masked final
    # row block -- no wrapper-side pad/slice copies) and non-128 channel widths.
    in2, out2 = 32, 96
    x2 = jax.random.normal(k_x2, (5, 3, in2), dtype=jnp.float32)
    w2, b2 = init_params(k_p2, in2, out2, bias=True)
    y2 = jax.block_until_ready(pseudo_identity(x2, w2, b2))
    ref2 = jnp.concatenate([x2 @ w2 + b2, x2], axis=-1)
    assert y2.shape == (5, 3, out2), y2.shape
    assert jnp.allclose(y2, ref2, atol=1e-4, rtol=1e-4), float(jnp.max(jnp.abs(y2 - ref2)))

    print("KERNEL_OK")
</pallas_src>

<mosaic_0001>
module attributes {stable_mosaic.version = 11 : i64} {
  func.func @_pseudo_identity_kernel(%arg0: i32, %arg1: memref<16x128xf32, #tpu.memory_space<vmem>>, %arg2: memref<128x128xf32, #tpu.memory_space<vmem>>, %arg3: memref<1x128xf32, #tpu.memory_space<vmem>>, %arg4: memref<16x256xf32, #tpu.memory_space<vmem>>) attributes {dimension_semantics = [#tpu.dimension_semantics<parallel>], iteration_bounds = array<i64: 1>, scalar_prefetch = 0 : i64, scratch_operands = 0 : i64, tpu.core_type = #tpu.core_type<tc>, window_params = [{transform_indices = @transform_0, window_bounds = array<i64: 16, 128>}, {pipeline_mode = #tpu.pipeline_mode<synchronous>, transform_indices = @transform_1, window_bounds = array<i64: 128, 128>}, {pipeline_mode = #tpu.pipeline_mode<synchronous>, transform_indices = @transform_2, window_bounds = array<i64: 1, 128>}, {transform_indices = @transform_3, window_bounds = array<i64: 16, 256>}]} {
    %c0 = arith.constant 0 : index
    %c0_0 = arith.constant 0 : index
    %0 = vector.load %arg1[%c0, %c0_0] : memref<16x128xf32, #tpu.memory_space<vmem>>, vector<16x128xf32>
    %c0_1 = arith.constant 0 : index
    %c0_2 = arith.constant 0 : index
    %1 = vector.load %arg2[%c0_1, %c0_2] : memref<128x128xf32, #tpu.memory_space<vmem>>, vector<128x128xf32>
    %cst = arith.constant dense<0.000000e+00> : vector<16x128xf32>
    %2 = tpu.matmul %0, %1, %cst {dimension_numbers = #tpu.dot_dimension_numbers<[1], [0], [0], [1], [0, 0, 1, 1], [], []>} : vector<16x128xf32>, vector<128x128xf32>, vector<16x128xf32> -> vector<16x128xf32>
    %c0_3 = arith.constant 0 : index
    %c0_4 = arith.constant 0 : index
    %3 = vector.load %arg3[%c0_3, %c0_4] : memref<1x128xf32, #tpu.memory_space<vmem>>, vector<1x128xf32>
    %4 = vector.broadcast %3 : vector<1x128xf32> to vector<16x128xf32>
    %5 = arith.addf %2, %4 : vector<16x128xf32>
    %c0_5 = arith.constant 0 : index
    %c0_6 = arith.constant 0 : index
    %6 = vector.load %arg4[%c0_5, %c0_6] : memref<16x256xf32, #tpu.memory_space<vmem>>, vector<16x128xf32>
    tpu.vector_store %arg4[%c0_5, %c0_6], %5 {strides = array<i32>} : memref<16x256xf32, #tpu.memory_space<vmem>>, vector<16x128xf32>,
    %c0_7 = arith.constant 0 : index
    %c0_8 = arith.constant 0 : index
    %7 = vector.load %arg1[%c0_7, %c0_8] : memref<16x128xf32, #tpu.memory_space<vmem>>, vector<16x128xf32>
    %c0_9 = arith.constant 0 : index
    %c128 = arith.constant 128 : index
    %8 = vector.load %arg4[%c0_9, %c128] : memref<16x256xf32, #tpu.memory_space<vmem>>, vector<16x128xf32>
    tpu.vector_store %arg4[%c0_9, %c128], %7 {strides = array<i32>} : memref<16x256xf32, #tpu.memory_space<vmem>>, vector<16x128xf32>,
    return
  }
  func.func @transform_0(%arg0: i32) -> (i32, i32) {
    %c0_i32 = arith.constant 0 : i32
    %c0_i32_0 = arith.constant 0 : i32
    return %arg0, %c0_i32 : i32, i32
  }
  func.func @transform_1(%arg0: i32) -> (i32, i32) {
    %c0_i32 = arith.constant 0 : i32
    %c0_i32_0 = arith.constant 0 : i32
    %c0_i32_1 = arith.constant 0 : i32
    return %c0_i32, %c0_i32_0 : i32, i32
  }
  func.func @transform_2(%arg0: i32) -> (i32, i32) {
    %c0_i32 = arith.constant 0 : i32
    %c0_i32_0 = arith.constant 0 : i32
    %c0_i32_1 = arith.constant 0 : i32
    return %c0_i32, %c0_i32_0 : i32, i32
  }
  func.func @transform_3(%arg0: i32) -> (i32, i32) {
    %c0_i32 = arith.constant 0 : i32
    %c0_i32_0 = arith.constant 0 : i32
    return %arg0, %c0_i32 : i32, i32
  }
}

</mosaic_0001>

<bundles_post_ra>
// kernel: tpu_custom_call.1
= control target key start
LH: loop header
LB: loop body
LE: loop exit
PB: predicated region body
PF: predicated region fallthrough
CT: control target
= control target key end

     0   :  { %8 = vsyncpa [#allocation3], 0  ;;  %s333_s0 = inlined_call_operand.hbm [shape: f32[16,128], index: 0, kind: input, shape index: {}]   ;;  %s334_s1 = inlined_call_operand.hbm [shape: f32[128,128], index: 1, kind: input, shape index: {}]   ;;  %s335_s2 = inlined_call_operand.vmem [shape: f32[1,128], index: 2, kind: input, shape index: {}]   ;;  %s336_s3 = inlined_call_operand.hbm [shape: f32[16,256], index: 3, kind: output, shape index: {}]  }
   0x1   :  { %9 = vsyncpa [#allocation6], 0 }
   0x2   :  { %10 = vsyncpa [#allocation4], 0  ;;  %s294_s12 = smov [#allocation2]  }
   0x3   :  { %s16_s13 = sshll.u32 %s294_s12, 4  ;;  %s17_s13 = int_to_ptr.vmem [resolvable:$true] %s16_s13 }
   0x4   :  { %s236_s14 = scalar_lea.vmem %s17_s13, 256  ;;  %p241_p1 = scmp.lt.s32.totalorder %s17_s13, %s17_s13 }
   0x5   :  { %p237_p0 = scmp.ne.s32.totalorder %s17_s13, %s236_s14  ;;  %p242_p2 = scmp.lt.s32.totalorder %s236_s14, %s236_s14 }
   0x7   :  { %p243_p3 = por %p242_p2, %p241_p1 }
   0x9   :  { %p244_p4 = pnand %p243_p3, %p237_p0 }
   0xb   :  { %247 = shalt.err (!%p244_p4)
}
   0xc   :  { %s295_s15 = smov 128   ;;  %s296_s16 = smov 8  }
   0xd   :  { %22 = dma.hbm_to_vmem [thread:$0]  %s333_s0, 256, %s17_s13, [#allocation3], %s295_s15, %s295_s15, %s296_s16  }
   0xe   :  { %s297_s19 = smov [#allocation5]  }
   0xf   :  { %s28_s20 = sshll.u32 %s297_s19, 4  ;;  %s29_s20 = int_to_ptr.vmem [resolvable:$true] %s28_s20 }
  0x10   :  { %s256_s21 = scalar_lea.vmem %s29_s20, 2048  ;;  %p261_p6 = scmp.lt.s32.totalorder %s29_s20, %s29_s20 }
  0x11   :  { %p257_p5 = scmp.ne.s32.totalorder %s29_s20, %s256_s21  ;;  %p262_p7 = scmp.lt.s32.totalorder %s256_s21, %s256_s21 }
  0x13   :  { %p263_p8 = por %p262_p7, %p261_p6 }
  0x15   :  { %p264_p9 = pnand %p263_p8, %p257_p5 }
  0x17   :  { %267 = shalt.err (!%p264_p9)
}
  0x18   :  { %34 = dma.hbm_to_vmem [thread:$0]  %s334_s1, 2048, %s29_s20, [#allocation6], %s295_s15, %s295_s15, %s296_s16  }
  0x19   :  { %288 = dma.done.wait [#allocation3], 256  }
  0x1a   :  { %289 = vsyncadd [#allocation3], 4294967040 }
  0x1b   :  { %290 = dma.done.wait [#allocation6], 2048  }
  0x1c   :  { %291 = vsyncadd [#allocation6], 4294965248  ;;  %v60_v0 = vld [vmem:[#allocation5 + $0x78] sm:$0xff]  ;;  %v59_v1 = vld [vmem:[#allocation5 + $0x70] sm:$0xff]  ;;  %s298_s24 = smov [#allocation7]  }
  0x1d   :  { %186 = vmatprep.subr.mxu0 %v60_v0  ;;  %v58_v2 = vld [vmem:[#allocation5 + $0x68] sm:$0xff]  ;;  %v57_v3 = vld [vmem:[#allocation5 + $0x60] sm:$0xff]  ;;  %v43_v4 = vld [vmem:[#allocation2] sm:$0xff]  ;;  %s154_s25 = sshll.u32 %s298_s24, 4  ;;  %s155_s25 = int_to_ptr.vmem [resolvable:$true] %s154_s25 }
  0x1e   :  { %187 = vmatpush3.msra.mxu0 %v60_v0  ;;  %v44_v5 = vld [vmem:[#allocation2 + $0x8] sm:$0xff]  ;;  %218 = vmatprep.mubr.f32.mxu0 %v43_v4  ;;  %147 = vst [vmem:[#allocation7 + $0x8] sm:$0xff] %v43_v4  ;;  %v55_v7 = vld [vmem:[#allocation5 + $0x50] sm:$0xff]  ;;  %v54_v8 = vld [vmem:[#allocation5 + $0x48] sm:$0xff]  ;;  %s268_s26 = scalar_lea.vmem %s155_s25, 512  ;;  %p273_p11 = scmp.lt.s32.totalorder %s155_s25, %s155_s25 }
  0x1f   :  { %188 = vmatprep.subr.mxu0 %v59_v1  ;;  %v56_v6 = vld [vmem:[#allocation5 + $0x58] sm:$0xff]  ;;  %148 = vst [vmem:[#allocation7 + $0x18] sm:$0xff] %v44_v5  ;;  %v53_v9 = vld [vmem:[#allocation5 + $0x40] sm:$0xff]  ;;  %v51_v11 = vld [vmem:[#allocation5 + $0x30] sm:$0xff]  ;;  %p269_p10 = scmp.ne.s32.totalorder %s155_s25, %s268_s26  ;;  %p274_p12 = scmp.lt.s32.totalorder %s268_s26, %s268_s26 }
  0x20   :  { %189 = vmatpush3.msra.mxu0 %v59_v1  ;;  %v52_v10 = vld [vmem:[#allocation5 + $0x38] sm:$0xff]  ;;  %v50_v12 = vld [vmem:[#allocation5 + $0x28] sm:$0xff]  ;;  %v49_v13 = vld [vmem:[#allocation5 + $0x20] sm:$0xff] }
  0x21   :  { %190 = vmatprep.subr.mxu0 %v58_v2  ;;  %v48_v14 = vld [vmem:[#allocation5 + $0x18] sm:$0xff]  ;;  %v47_v15 = vld [vmem:[#allocation5 + $0x10] sm:$0xff]  ;;  %v46_v16 = vld [vmem:[#allocation5 + $0x8] sm:$0xff]  ;;  %p275_p13 = por %p274_p12, %p273_p11 }
  0x22   :  { %191 = vmatpush3.msra.mxu0 %v58_v2  ;;  %v45_v17 = vld [vmem:[#allocation5] sm:$0xff]  ;;  %v167_v18 = vld [vmem:[%s335_s2] ss:$0 sm:$0xff] }
  0x23   :  { %192 = vmatprep.subr.mxu0 %v57_v3  ;;  %p276_p0 = pnand %p275_p13, %p269_p10 }
  0x24   :  { %193 = vmatpush3.msra.mxu0 %v57_v3 }
  0x25   :  { %194 = vmatprep.subr.mxu0 %v56_v6 }
  0x26   :  { %195 = vmatpush3.msra.mxu0 %v56_v6 }
  0x27   :  { %196 = vmatprep.subr.mxu0 %v55_v7 }
  0x28   :  { %197 = vmatpush3.msra.mxu0 %v55_v7 }
  0x29   :  { %198 = vmatprep.subr.mxu0 %v54_v8 }
  0x2a   :  { %199 = vmatpush3.msra.mxu0 %v54_v8 }
  0x2b   :  { %200 = vmatprep.subr.mxu0 %v53_v9 }
  0x2c   :  { %201 = vmatpush3.msra.mxu0 %v53_v9 }
  0x2d   :  { %202 = vmatprep.subr.mxu0 %v52_v10 }
  0x2e   :  { %203 = vmatpush3.msra.mxu0 %v52_v10 }
  0x2f   :  { %204 = vmatprep.subr.mxu0 %v51_v11 }
  0x30   :  { %205 = vmatpush3.msra.mxu0 %v51_v11 }
  0x31   :  { %206 = vmatprep.subr.mxu0 %v50_v12 }
  0x32   :  { %207 = vmatpush3.msra.mxu0 %v50_v12 }
  0x33   :  { %208 = vmatprep.subr.mxu0 %v49_v13 }
  0x34   :  { %209 = vmatpush3.msra.mxu0 %v49_v13 }
  0x35   :  { %210 = vmatprep.subr.mxu0 %v48_v14 }
  0x36   :  { %211 = vmatpush3.msra.mxu0 %v48_v14 }
  0x37   :  { %212 = vmatprep.subr.mxu0 %v47_v15 }
  0x38   :  { %213 = vmatpush3.msra.mxu0 %v47_v15 }
  0x39   :  { %214 = vmatprep.subr.mxu0 %v46_v16 }
  0x3a   :  { %215 = vmatpush3.msra.mxu0 %v46_v16 }
  0x3b   :  { %216 = vmatprep.subr.mxu0 %v45_v17 }
  0x3c   :  { %217 = vmatpush3.msra.mxu0 %v45_v17 }
  0x3d   :  { %219 = vmatmul.mubr.f32.vlgmr.msra.gmra.mxu0 %v44_v5 }
  0xfd   :  { %v220_v19 = vpop.f32.mrf.mxu0 }
  0xfe   :  { %v140_v20 = vadd.f32 %v220_v19, %v167_v18 }
  0xff   :  { %v134_v21 = vpop.f32.mrf.mxu0 }
 0x100   :  { %144 = vst [vmem:[#allocation7 + $0x10] sm:$0xff] %v140_v20  ;;  %v135_v22 = vadd.f32 %v167_v18, %v134_v21 }
 0x102   :  { %143 = vst [vmem:[#allocation7] sm:$0xff] %v135_v22 }
 0x103   :  { %279 = shalt.err (!%p276_p0)
}
 0x104   :  { %s299_s27 = smov 256   ;;  %s300_s28 = smov 16  }
 0x105   :  { %160 = dma.vmem_to_hbm [thread:$0]  %s155_s25, 512, %s336_s3, [#allocation4], %s299_s27, %s299_s27, %s300_s28  }
 0x106   :  { %292 = dma.done.wait [#allocation4], 512  }
 0x107   :  { %293 = vsyncadd [#allocation4], 4294966784 }
 0x108   :  { %164 = vsyncpa [#allocation3], 1 }
 0x109   :  { %165 = vsyncpa [#allocation6], 1 }
 0x10a   :  { %166 = vsyncpa [#allocation4], 1 }

</bundles_post_ra>
